<compile_context>
chip_gen: v7x
topology: tpu7x:2x2x1
jax: 0.10.0
libtpu: 0.0.40
codegen_flags: <defaults>
</compile_context>

<pallas_src>
import functools

import jax
import jax.numpy as jnp
from jax import lax
from jax.experimental import pallas as pl
from jax.experimental.pallas import tpu as pltpu

BLOCKSIZE = 4096  # bitsandbytes quantize_blockwise block size (chunk_size % 4096 == 0)


def _round_up(a: int, b: int) -> int:
    return ((a + b - 1) // b) * b


# -----------------------------------------------------------------------------
# One-time capability probe (cached): does the 256-entry LUT gather lower on this
# jax/libtpu combination, and at which codebook dtype?  Runs on tiny shapes, never
# in the hot forward path.
# -----------------------------------------------------------------------------
@functools.lru_cache(maxsize=None)
def _lut_gather_dtype():
    for dt in (jnp.bfloat16, jnp.float32):   # prefer bf16: no per-tile f32->bf16 cast
        try:
            table = (jnp.arange(256, dtype=jnp.float32) * 0.5 - 64.0).astype(dt)
            idx = (jnp.arange(8 * 128, dtype=jnp.int32) % 256).reshape(8, 128)

            def probe(t_ref, i_ref, o_ref):
                o_ref[...] = t_ref[...].at[i_ref[...]].get(mode="promise_in_bounds")

            out = pl.pallas_call(
                probe,
                out_shape=jax.ShapeDtypeStruct((8, 128), dt),
                in_specs=[pl.BlockSpec(memory_space=pltpu.MemorySpace.VMEM),
                          pl.BlockSpec(memory_space=pltpu.MemorySpace.VMEM)],
                out_specs=pl.BlockSpec(memory_space=pltpu.MemorySpace.VMEM),
            )(table, idx)
            out = jax.block_until_ready(out)
            if bool(jnp.allclose(out.astype(jnp.float32),
                                 table[idx].astype(jnp.float32))):
                return dt
        except Exception:
            # Gather lowering rejected for this dtype on this backend -> try next.
            pass
    return None


def _make_kernel(in_kernel_dequant: bool, kc: int, n_sub: int):
    """Fused dequant + matmul.  Grid = (i over M, j over N, k over K); K innermost."""

    def body(x_ref, w_ref, code_ref, scale_ref, bias_ref, o_ref):
        k = pl.program_id(2)

        @pl.when(k == 0)
        def _():
            o_ref[...] = jnp.zeros_like(o_ref)

        code_vals = code_ref[...] if in_kernel_dequant else None    # (256,)

        # Process the K tile in kc-wide sub-chunks with STATIC slices: small dequant
        # intermediate, gather/cast overlaps the MXU pushes of the previous chunk.
        for s in range(n_sub):
            lo = s * kc
            w_blk = w_ref[lo:lo + kc, :]                            # (kc, tn)
            if in_kernel_dequant:
                idx = w_blk.astype(jnp.int32)
                w_bf = code_vals.at[idx].get(
                    mode="promise_in_bounds").astype(jnp.bfloat16)  # (kc, tn) bf16
            else:
                w_bf = w_blk                                        # pre-dequantized bf16
            # (tm, kc) x (kc, tn) on the MXU (RHS contracts its leading dim -> no
            # transpose); f32 accumulate directly into the resident output block.
            o_ref[...] += lax.dot_general(
                x_ref[:, lo:lo + kc], w_bf,
                dimension_numbers=(((1,), (0,)), ((), ())),
                preferred_element_type=jnp.float32)

        # Finalize: per-output-feature absmax scale and bias applied once.
        @pl.when(k == pl.num_programs(2) - 1)
        def _():
            o_ref[...] = o_ref[...] * scale_ref[...] + bias_ref[...]

    if in_kernel_dequant:
        def kernel(x_ref, w_ref, code_ref, scale_ref, bias_ref, o_ref):
            body(x_ref, w_ref, code_ref, scale_ref, bias_ref, o_ref)
    else:
        def kernel(x_ref, w_ref, scale_ref, bias_ref, o_ref):
            body(x_ref, w_ref, None, scale_ref, bias_ref, o_ref)
    return kernel


def frozen_bnb_linear(x, weight_q, absmax, code, bias=None, *,
                      tm=512, tn=512, tk=1024):
    """Forward of FrozenBNBLinear: dequantize_blockwise(weight) then F.linear(x, W, b).

    weight_q: uint8 (out_f, in_f); absmax: f32 (ceil(numel/4096),); code: f32 (256,).
    """
    out_f, in_f = weight_q.shape

    # Each 4096-element absmax block spans whole weight rows when in_f | 4096, so the
    # dequant scale collapses to one scalar per output feature, applied after the K
    # reduction (hoisted out of the K loop).
    assert BLOCKSIZE % in_f == 0, "demo assumes quant blocks align to weight rows"
    row_scale = absmax[(jnp.arange(out_f) * in_f) // BLOCKSIZE].astype(jnp.float32)
    scale2 = row_scale.reshape(1, out_f)

    if bias is None:
        bias = jnp.zeros((out_f,), jnp.float32)
    bias2 = bias.reshape(1, out_f).astype(jnp.float32)

    # One-time prep of frozen buffers (a real module would cache these at init):
    # pre-transpose so the kernel never transposes the dequantized tile.
    wq_t = jnp.transpose(weight_q)                       # (in_f, out_f) uint8

    lut_dt = _lut_gather_dtype()
    in_kernel_dequant = lut_dt is not None
    if in_kernel_dequant:
        w_operand = wq_t                                 # uint8 stays compact in HBM
        code_arr = code.reshape(256).astype(lut_dt)      # bf16 codebook if supported
    else:
        # TODO(synk): LUT gather not supported by this lowering -> one-time wrapper
        # pre-dequant (unscaled, bf16); loses the uint8-in-HBM memory saving only.
        w_operand = code.astype(jnp.bfloat16)[wq_t.astype(jnp.int32)]   # (in_f, out_f)
        code_arr = None

    lead = x.shape[:-1]
    x2 = x.reshape(-1, in_f).astype(jnp.bfloat16)        # bf16 activations for the MXU
    m = x2.shape[0]

    # ---- tiling ----
    tn = min(tn, out_f)
    tk = min(tk, in_f)
    # TODO(synk): pad N/K instead of asserting for fully general (non-divisible) shapes.
    assert out_f % tn == 0 and in_f % tk == 0, "out/in features must divide the tiles"

    # Large tm amortizes the per-(j, k) weight dequant across many activation rows.
    tm = min(tm, _round_up(m, 16))       # bf16 sublane packing -> multiples of 16
    m_pad = _round_up(m, tm)
    if m_pad != m:
        x2 = jnp.pad(x2, ((0, m_pad - m), (0, 0)))

    # v7x shards "parallel" grid axes over 2 TensorCores: keep >= 2 parallel tiles
    # for tiny (decode-sized) problems.
    if (m_pad // tm) * (out_f // tn) < 2 and tn >= 256 and out_f % (tn // 2) == 0:
        tn //= 2

    # In-kernel K sub-chunk width (static slices).
    if tk % 256 == 0:
        kc = 256
    elif tk % 128 == 0:
        kc = 128
    else:
        kc = tk
    n_sub = tk // kc

    grid = (m_pad // tm, out_f // tn, in_f // tk)

    in_specs = [
        pl.BlockSpec((tm, tk), lambda i, j, k: (i, k)),   # x tile (bf16)
        pl.BlockSpec((tk, tn), lambda i, j, k: (k, j)),   # weight tile (uint8 | bf16)
    ]
    operands = [x2, w_operand]
    if in_kernel_dequant:
        in_specs.append(pl.BlockSpec(memory_space=pltpu.MemorySpace.VMEM))  # codebook
        operands.append(code_arr)
    in_specs += [
        pl.BlockSpec((1, tn), lambda i, j, k: (0, j)),    # per-row absmax scale
        pl.BlockSpec((1, tn), lambda i, j, k: (0, j)),    # bias
    ]
    operands += [scale2, bias2]

    out = pl.pallas_call(
        _make_kernel(in_kernel_dequant, kc, n_sub),
        out_shape=jax.ShapeDtypeStruct((m_pad, out_f), jnp.float32),
        grid_spec=pltpu.PrefetchScalarGridSpec(
            num_scalar_prefetch=0,
            grid=grid,
            in_specs=in_specs,
            out_specs=pl.BlockSpec((tm, tn), lambda i, j, k: (i, j)),
        ),
        compiler_params=pltpu.CompilerParams(
            dimension_semantics=("parallel", "parallel", "arbitrary"),
            vmem_limit_bytes=32 * 1024 * 1024),
    )(*operands)

    return out[:m].reshape(*lead, out_f)


if __name__ == "__main__":
    key = jax.random.PRNGKey(0)
    k1, k2, k3, k4 = jax.random.split(key, 4)

    in_features, out_features = 512, 256
    batch, seq = 2, 8

    # Deterministic synthetic "quantized" buffers (shapes match FrozenBNBLinear.__init__):
    #   weight: uint8 (out, in), absmax: f32 (numel // 4096,), code: f32 (256,), bias: f32 (out,)
    weight_q = jax.random.randint(k1, (out_features, in_features), 0, 256,
                                  dtype=jnp.int32).astype(jnp.uint8)
    n_blocks = (out_features * in_features) // BLOCKSIZE
    absmax = jax.random.uniform(k2, (n_blocks,), jnp.float32, 0.5, 2.0)
    t = jnp.linspace(-1.0, 1.0, 256, dtype=jnp.float32)
    code = jnp.sign(t) * jnp.abs(t) ** 1.5          # nonlinear codebook in [-1, 1]
    bias = jax.random.normal(k3, (out_features,), jnp.float32)

    x = jax.random.normal(k4, (batch, seq, in_features), jnp.float32)

    out = jax.block_until_ready(frozen_bnb_linear(x, weight_q, absmax, code, bias))

    # Pure-JAX reference of dequantize_blockwise + F.linear (f32 end-to-end).
    flat_scale = jnp.repeat(absmax, BLOCKSIZE)[: out_features * in_features]
    w_deq = code[weight_q.astype(jnp.int32)] * flat_scale.reshape(out_features, in_features)
    ref = jnp.einsum("bsi,oi->bso", x, w_deq, precision=lax.Precision.HIGHEST) + bias

    assert out.shape == (batch, seq, out_features)
    err = float(jnp.max(jnp.abs(out - ref)))
    tol = 2e-2 * float(jnp.max(jnp.abs(ref))) + 2e-2   # bf16 inputs/weights, f32 accumulation
    assert err <= tol, (err, tol)
    print("KERNEL_OK")
</pallas_src>

<mosaic_0001>
module attributes {stable_mosaic.version = 11 : i64} {
  func.func @kernel(%arg0: i32, %arg1: i32, %arg2: i32, %arg3: memref<16x512xbf16, #tpu.memory_space<vmem>>, %arg4: memref<512x128xbf16, #tpu.memory_space<vmem>>, %arg5: memref<1x128xf32, #tpu.memory_space<vmem>>, %arg6: memref<1x128xf32, #tpu.memory_space<vmem>>, %arg7: memref<16x128xf32, #tpu.memory_space<vmem>>) attributes {dimension_semantics = [#tpu.dimension_semantics<parallel>, #tpu.dimension_semantics<parallel>, #tpu.dimension_semantics<arbitrary>], iteration_bounds = array<i64: 1, 2, 1>, scalar_prefetch = 0 : i64, scratch_operands = 0 : i64, tpu.core_type = #tpu.core_type<tc>, window_params = [{transform_indices = @transform_0, window_bounds = array<i64: 16, 512>}, {transform_indices = @transform_1, window_bounds = array<i64: 512, 128>}, {transform_indices = @transform_2, window_bounds = array<i64: 1, 128>}, {transform_indices = @transform_3, window_bounds = array<i64: 1, 128>}, {transform_indices = @transform_4, window_bounds = array<i64: 16, 128>}]} {
    %c0_i32 = arith.constant 0 : i32
    %0 = arith.cmpi eq, %arg2, %c0_i32 : i32
    %1 = arith.extui %0 : i1 to i32
    %c0_i32_0 = arith.constant 0 : i32
    %2 = arith.cmpi ne, %1, %c0_i32_0 : i32
    scf.if %2 {
      %cst_18 = arith.constant 0.000000e+00 : f32
      %18 = vector.broadcast %cst_18 : f32 to vector<16x128xf32>
      %c0_19 = arith.constant 0 : index
      %c0_20 = arith.constant 0 : index
      %19 = vector.load %arg7[%c0_19, %c0_20] : memref<16x128xf32, #tpu.memory_space<vmem>>, vector<16x128xf32>
      tpu.vector_store %arg7[%c0_19, %c0_20], %18 {strides = array<i32>} : memref<16x128xf32, #tpu.memory_space<vmem>>, vector<16x128xf32>,
    } else {
    }
    %c0 = arith.constant 0 : index
    %c0_1 = arith.constant 0 : index
    %3 = vector.load %arg4[%c0, %c0_1] : memref<512x128xbf16, #tpu.memory_space<vmem>>, vector<256x128xbf16>
    %c0_2 = arith.constant 0 : index
    %c0_3 = arith.constant 0 : index
    %4 = vector.load %arg7[%c0_2, %c0_3] : memref<16x128xf32, #tpu.memory_space<vmem>>, vector<16x128xf32>
    %c0_4 = arith.constant 0 : index
    %c0_5 = arith.constant 0 : index
    %5 = vector.load %arg3[%c0_4, %c0_5] : memref<16x512xbf16, #tpu.memory_space<vmem>>, vector<16x256xbf16>
    %cst = arith.constant dense<0.000000e+00> : vector<16x128xf32>
    %6 = tpu.matmul %5, %3, %cst {dimension_numbers = #tpu.dot_dimension_numbers<[1], [0], [0], [1], [0, 0, 1, 1], [], []>} : vector<16x256xbf16>, vector<256x128xbf16>, vector<16x128xf32> -> vector<16x128xf32>
    %7 = arith.addf %4, %6 : vector<16x128xf32>
    %c0_6 = arith.constant 0 : index
    %c0_7 = arith.constant 0 : index
    %8 = vector.load %arg7[%c0_6, %c0_7] : memref<16x128xf32, #tpu.memory_space<vmem>>, vector<16x128xf32>
    tpu.vector_store %arg7[%c0_6, %c0_7], %7 {strides = array<i32>} : memref<16x128xf32, #tpu.memory_space<vmem>>, vector<16x128xf32>,
    %c256 = arith.constant 256 : index
    %c0_8 = arith.constant 0 : index
    %9 = vector.load %arg4[%c256, %c0_8] : memref<512x128xbf16, #tpu.memory_space<vmem>>, vector<256x128xbf16>
    %c0_9 = arith.constant 0 : index
    %c0_10 = arith.constant 0 : index
    %10 = vector.load %arg7[%c0_9, %c0_10] : memref<16x128xf32, #tpu.memory_space<vmem>>, vector<16x128xf32>
    %c0_11 = arith.constant 0 : index
    %c256_12 = arith.constant 256 : index
    %11 = vector.load %arg3[%c0_11, %c256_12] : memref<16x512xbf16, #tpu.memory_space<vmem>>, vector<16x256xbf16>
    %cst_13 = arith.constant dense<0.000000e+00> : vector<16x128xf32>
    %12 = tpu.matmul %11, %9, %cst_13 {dimension_numbers = #tpu.dot_dimension_numbers<[1], [0], [0], [1], [0, 0, 1, 1], [], []>} : vector<16x256xbf16>, vector<256x128xbf16>, vector<16x128xf32> -> vector<16x128xf32>
    %13 = arith.addf %10, %12 : vector<16x128xf32>
    %c0_14 = arith.constant 0 : index
    %c0_15 = arith.constant 0 : index
    %14 = vector.load %arg7[%c0_14, %c0_15] : memref<16x128xf32, #tpu.memory_space<vmem>>, vector<16x128xf32>
    tpu.vector_store %arg7[%c0_14, %c0_15], %13 {strides = array<i32>} : memref<16x128xf32, #tpu.memory_space<vmem>>, vector<16x128xf32>,
    %c0_i32_16 = arith.constant 0 : i32
    %15 = arith.cmpi eq, %arg2, %c0_i32_16 : i32
    %16 = arith.extui %15 : i1 to i32
    %c0_i32_17 = arith.constant 0 : i32
    %17 = arith.cmpi ne, %16, %c0_i32_17 : i32
    scf.if %17 {
      %c0_18 = arith.constant 0 : index
      %c0_19 = arith.constant 0 : index
      %18 = vector.load %arg7[%c0_18, %c0_19] : memref<16x128xf32, #tpu.memory_space<vmem>>, vector<16x128xf32>
      %c0_20 = arith.constant 0 : index
      %c0_21 = arith.constant 0 : index
      %19 = vector.load %arg5[%c0_20, %c0_21] : memref<1x128xf32, #tpu.memory_space<vmem>>, vector<1x128xf32>
      %20 = vector.broadcast %19 : vector<1x128xf32> to vector<16x128xf32>
      %21 = arith.mulf %18, %20 : vector<16x128xf32>
      %c0_22 = arith.constant 0 : index
      %c0_23 = arith.constant 0 : index
      %22 = vector.load %arg6[%c0_22, %c0_23] : memref<1x128xf32, #tpu.memory_space<vmem>>, vector<1x128xf32>
      %23 = vector.broadcast %22 : vector<1x128xf32> to vector<16x128xf32>
      %24 = arith.addf %21, %23 : vector<16x128xf32>
      %c0_24 = arith.constant 0 : index
      %c0_25 = arith.constant 0 : index
      %25 = vector.load %arg7[%c0_24, %c0_25] : memref<16x128xf32, #tpu.memory_space<vmem>>, vector<16x128xf32>
      tpu.vector_store %arg7[%c0_24, %c0_25], %24 {strides = array<i32>} : memref<16x128xf32, #tpu.memory_space<vmem>>, vector<16x128xf32>,
    } else {
    }
    return
  }
  func.func @transform_0(%arg0: i32, %arg1: i32, %arg2: i32) -> (i32, i32) {
    %c0_i32 = arith.constant 0 : i32
    return %arg0, %arg2 : i32, i32
  }
  func.func @transform_1(%arg0: i32, %arg1: i32, %arg2: i32) -> (i32, i32) {
    %c0_i32 = arith.constant 0 : i32
    return %arg2, %arg1 : i32, i32
  }
  func.func @transform_2(%arg0: i32, %arg1: i32, %arg2: i32) -> (i32, i32) {
    %c0_i32 = arith.constant 0 : i32
    %c0_i32_0 = arith.constant 0 : i32
    return %c0_i32, %arg1 : i32, i32
  }
  func.func @transform_3(%arg0: i32, %arg1: i32, %arg2: i32) -> (i32, i32) {
    %c0_i32 = arith.constant 0 : i32
    %c0_i32_0 = arith.constant 0 : i32
    return %c0_i32, %arg1 : i32, i32
  }
  func.func @transform_4(%arg0: i32, %arg1: i32, %arg2: i32) -> (i32, i32) {
    %c0_i32 = arith.constant 0 : i32
    return %arg0, %arg1 : i32, i32
  }
}

</mosaic_0001>

<bundles_post_ra>
// kernel: tpu_custom_call.1
= control target key start
LH: loop header
LB: loop body
LE: loop exit
PB: predicated region body
PF: predicated region fallthrough
CT: control target
= control target key end

     0   :  { %9 = vsyncpa [#allocation3], 0  ;;  %s1508_s0 = inlined_call_operand.hbm [shape: bf16[16,512], index: 0, kind: input, shape index: {}]   ;;  %s1509_s1 = inlined_call_operand.hbm [shape: bf16[512,256], index: 1, kind: input, shape index: {}]   ;;  %s1510_s2 = inlined_call_operand.vmem [shape: f32[1,256], index: 2, kind: input, shape index: {}]   ;;  %s1511_s3 = inlined_call_operand.vmem [shape: f32[1,256], index: 3, kind: input, shape index: {}]   ;;  %s1512_s4 = inlined_call_operand.hbm [shape: f32[16,256], index: 4, kind: output, shape index: {}]  }
   0x1   :  { %10 = vsyncpa [#allocation6], 0 }
   0x2   :  { %12 = vsyncpa [#allocation6 + $0x1], 0 }
   0x3   :  { %13 = vsyncpa [#allocation4], 0 }
   0x4   :  { %15 = vsyncpa [#allocation4 + $0x1], 0  ;;  %s1245_s15 = smov 0   ;;  %s1247_s16 = smov 0  }
   0x5   :  { %s1249_s17 = smov 0   ;;  %s1251_s18 = smov 0  }
   0x6   :  { %s1253_s19 = smov 0   ;;  %s1255_s20 = smov 0  }
   0x7 LB: > { %s846_s21 = sadd.s32 4294967295, %s1207_s20   ;;  %s847_s22 = sadd.s32 4294967294, %s1207_s20   ;;  %s1207_s20 = sphi %s1255_s20, %s21_s20   ;;  %s1203_s19 = sphi %s1253_s19, %s1538_s19   ;;  %s1199_s18 = sphi %s1251_s18, %s1537_s18   ;;  %s1195_s17 = sphi %s1249_s17, %s1536_s17   ;;  %s1191_s16 = sphi %s1247_s16, %s1535_s16   ;;  %s1187_s15 = sphi %s1245_s15, %s1534_s15  }
   0x8   : > { %p84_p0 = scmp.ne.s32.totalorder %s1195_s17, %s1191_s16  ;;  %p85_p1 = scmp.eq.s32.totalorder %s1207_s20, 0 }
   0x9   : > { %p90_p2 = scmp.ne.s32.totalorder %s1191_s16, %s1187_s15  ;;  %p1282_p3 = scmp.eq.s32.totalorder %s846_s21, 0 }
   0xa   : > { %p1286_p4 = por %p85_p1, %p84_p0  ;;  %p168_p5 = scmp.eq.s32.totalorder %s846_s21, 1 }
   0xb   : > { %s1519_s23 = scalar_select %p1282_p3, 1, 0 }
   0xc   : > { %p1292_p6 = por %p1282_p3, %p90_p2  ;;  %p174_p7 = scmp.eq.s32.totalorder %s847_s22, 1 }
   0xd   : > { %p1296_p8 = por %p168_p5, %p84_p0  ;;  %p848_p9 = scmp.ge.s32.totalorder %s1207_s20, 1 }
   0xe   : > { %s1521_s25 = scalar_select %p1292_p6, 1, 0 }
   0xf   : > { %s1522_s26 = scalar_select %p1296_p8, 1, 0 }
  0x10   : > { %p1301_p10 = por %p174_p7, %p90_p2  ;;  %p181_p11 = scmp.lt.s32.totalorder %s1207_s20, 3 }
  0x11   : > { %s1209_s29 = smov [#allocation2]   ;;  %p964_p1 = scmp.lt.s32.totalorder %s1207_s20, 2 }
  0x12   : > { %s1523_s27 = scalar_select %p1301_p10, 1, 0 }
  0x13   : > { %p1306_p12 = pnand %p848_p9, %p181_p11  ;;  %s199_s30 = sshll.u32 %s1209_s29, 4  ;;  %s1310_s30 = int_to_ptr.vmem [resolvable:$true] %s199_s30 }
  0x14   : > { %p1324_p2 = pnand %p964_p1, %p1286_p4  ;;  %s36_s7 = sadd.s32 1, %s1203_s19 }
  0x15   : > { %s1524_s28 = scalar_select %p1306_p12, 1, 0 }
  0x16   : > { %p951_p13 = pneg %p1306_p12  ;;  %s1063_s10 = scalar_lea.hbm %s1508_s0, 512 }
  0x17   : > { %s1526_s6 = scalar_select %p1324_p2, 1, 0 }
  0x18   : > { %p1318_p5 = pnand %p951_p13, %p1282_p3  ;;  %p1064_p7 = scmp.ne.s32.totalorder %s1508_s0, %s1063_s10 }
  0x19   : > { %p1070_p4 = scmp.lt.u32.totalorder %s1063_s10, %s1508_s0 }
  0x1a   : > { %p1065_p9 = pneg %p1318_p5 }
  0x1c   : > { %p1066_p11 = pnand %p1065_p9, %p1064_p7 }
  0x1e   : > { %p1067_p13 = pneg %p1066_p11 }
  0x20   : > { %p1072_p1 = pnand %p1070_p4, %p1067_p13 }
  0x22   : > { %1075 = shalt.err (!%p1072_p1)
}
  0x23   : > { %s1076_s21 = scalar_lea.vmem %s1310_s30, 512  ;;  %p1084_p6 = scmp.lt.s32.totalorder %s1310_s30, %s1310_s30 }
  0x24   : > { %p1077_p0 = scmp.ne.s32.totalorder %s1310_s30, %s1076_s21  ;;  %p1085_p3 = scmp.lt.s32.totalorder %s1076_s21, %s1076_s21 }
  0x26   : > { %p1079_p10 = pnand %p1077_p0, %p1065_p9  ;;  %p1086_p12 = por %p1085_p3, %p1084_p6 }
  0x28   : > { %p1080_p8 = pneg %p1079_p10 }
  0x2a   : > { %p1087_p2 = pnand %p1086_p12, %p1080_p8 }
  0x2c   : > { %1090 = shalt.err (!%p1087_p2)
}
  0x2d   : > { %s1210_s22 = smov 256   ;;  %s1211_s24 = smov 16  }
  0x2e   : > { %954 = dma.hbm_to_vmem [thread:$0]  (!%p1318_p5), %s1508_s0, 512, %s1310_s30, [#allocation3], %s1210_s22, %s1210_s22, %s1211_s24  }
  0x2f   : > { %p38_p10 = scmp.ge.s32.totalorder %s36_s7, 2  ;;  %s77_s9 = sadd.s32 1, %s1195_s17 }
  0x30   : > { %s213_s10 = sand.u32 1, %s1195_s17   ;;  %s852_s13 = sshll.u32 %s1203_s19, 6 }
  0x31   : > { %s1540_s7 = smov (%p38_p10, %s36_s7), 0  ;;  %s851_s11 = sshll.u32 %s213_s10, 8 }
  0x32   : > { %s73_s12 = ssub.s32 %s1203_s19, %s1540_s7  ;;  %s1360_s5 = scalar_lea.hbm %s1509_s1, %s852_s13 }
  0x33   : > { %p75_p3 = scmp.eq.s32.totalorder %s73_s12, 0  ;;  %s217_s30 = scalar_lea.vmem [#allocation5], %s851_s11 }
  0x34   : > { %s226_s22 = sshll.u32 %s217_s30, 4  ;;  %s1367_s29 = scalar_lea.sflag [#allocation6], %s213_s10  ;;  %s1365_s22 = int_to_ptr.vmem [resolvable:$true] %s226_s22 }
  0x35   : > { %s1363_s24 = scalar_select %p75_p3, %s1195_s17, %s77_s9  }
  0x36   : > { %s1091_s8 = scalar_lea.hbm %s1360_s5, 4096  ;;  %p1527_p8 = scmp.ne.s32.totalorder %s1526_s6, 0 }
  0x37   : > { %p1092_p6 = scmp.ne.s32.totalorder %s1360_s5, %s1091_s8  ;;  %s1096_s14 = scalar_lea.hbm %s1509_s1, 8192 }
  0x38   : > { %p1093_p12 = pneg %p1527_p8  ;;  %p1097_p2 = scmp.lt.u32.totalorder %s1360_s5, %s1509_s1 }
  0x39   : > { %p1098_p7 = scmp.lt.u32.totalorder %s1096_s14, %s1091_s8  ;;  %p1100_p11 = scmp.lt.u32.totalorder %s1091_s8, %s1360_s5 }
  0x3a   : > { %p1094_p0 = pnand %p1093_p12, %p1092_p6 }
  0x3b   : > { %p1099_p9 = por %p1098_p7, %p1097_p2 }
  0x3c   : > { %p1095_p5 = pneg %p1094_p0 }
  0x3d   : > { %p1101_p13 = por %p1100_p11, %p1099_p9 }
  0x3f   : > { %p1102_p4 = pnand %p1101_p13, %p1095_p5 }
  0x41   : > { %1105 = shalt.err (!%p1102_p4)
}
  0x42   : > { %s1106_s9 = scalar_lea.vmem %s1365_s22, 4096  ;;  %s1212_s10 = smov [#allocation5]  }
  0x43   : > { %p1107_p1 = scmp.ne.s32.totalorder %s1365_s22, %s1106_s9  ;;  %s1111_s30 = sshll.u32 %s1212_s10, 4  ;;  %s1112_s30 = int_to_ptr.vmem [resolvable:$false] %s1111_s30 }
  0x44   : > { %s1113_s12 = scalar_lea.vmem %s1112_s30, 8192  ;;  %p1114_p6 = scmp.lt.s32.totalorder %s1365_s22, %s1112_s30 }
  0x45   : > { %p1109_p10 = pnand %p1107_p1, %p1093_p12  ;;  %p1115_p0 = scmp.lt.s32.totalorder %s1113_s12, %s1106_s9 }
  0x47   : > { %p1110_p3 = pneg %p1109_p10  ;;  %p1116_p2 = por %p1115_p0, %p1114_p6 }
  0x49   : > { %p1117_p7 = pnand %p1116_p2, %p1110_p3 }
  0x4b   : > { %1120 = shalt.err (!%p1117_p7)
}
  0x4c   : > { %s1213_s8 = smov 128   ;;  %s1214_s13 = smov 64  }
  0x4d   : > { %s1215_s14 = smov 4   ;;  %p1528_p12 = scmp.ne.s32.totalorder %s1524_s28, 0 }
  0x4e   : > { %958 = dma.hbm_to_vmem [thread:$0]  (!%p1527_p8), %s1360_s5, 4096, %s1365_s22, %s1367_s29, %s1213_s8, %s1214_s13, %s1215_s14  }
  0x4f   : > { %250 = sbr.rel (%p1528_p12) target bundleno = 365 (0x16d), region = 36  ;;  %p1529_p5 = scmp.ne.s32.totalorder (!%p1528_p12), %s1519_s23, 0 }
  0x56   : > { %1174 = dma.done.wait (%p1529_p5), [#allocation3], 512  }
  0x57   : > { %1176 = vsyncadd (%p1529_p5), [#allocation3], 4294966784  ;;  %s1402_s11 = sand.u32 1, %s1191_s16   ;;  %p1530_p8 = scmp.ne.s32.totalorder %s1521_s25, 0 }
  0x58   : > { %s855_s21 = sshll.u32 %s1402_s11, 8  ;;  %s257_s9 = scalar_lea.sflag [#allocation6], %s1402_s11 }
  0x59   : > { %s1406_s10 = scalar_lea.vmem [#allocation5], %s855_s21 }
  0x5a   : > { %1178 = dma.done.wait (%p1530_p8), %s257_s9, 4096  }
  0x5b   : > { %1180 = vsyncadd (%p1530_p8), %s257_s9, 4294963200  ;;  %v1025_v0 = vld [vmem:[%s1406_s10 + $0x40] sm:$0xff]   ;;  %v1027_v2 = vld [vmem:[%s1406_s10 + $0x48] sm:$0xff]   ;;  %p294_p9 = scmp.lt.s32.totalorder %s1199_s18, 1  ;;  %s856_s25 = sshll.u32 %s1402_s11, 4 }
  0x5c   : > { %v1026_v1 = vld [vmem:[%s1406_s10] sm:$0xff]   ;;  %899 = vmatprep.subr.bf16.mxu0 %v1025_v0  ;;  %v1028_v3 = vld [vmem:[%s1406_s10 + $0x8] sm:$0xff]   ;;  %v1030_v5 = vld [vmem:[%s1406_s10 + $0x50] sm:$0xff]   ;;  %s896_s12 = sshll.u32 %s1199_s18, 7  ;;  %s290_s8 = scalar_lea.vmem [#allocation7], %s856_s25 }
  0x5d   : > { %900 = vmatpush3.bf16.msra.mxu0 %v1026_v1  ;;  %v1029_v4 = vld [vmem:[%s1406_s10 + $0xc0] sm:$0xff]   ;;  %v1032_v7 = vld [vmem:[%s1406_s10 + $0x10] sm:$0xff]   ;;  %v1033_v8 = vld [vmem:[%s1406_s10 + $0xc8] sm:$0xff]   ;;  %s295_s23 = scalar_select %p294_p9, %s1199_s18, 1 }
  0x5e   : > { %901 = vmatprep.subr.bf16.mxu0 %v1027_v2  ;;  %921 = vmatprep.subr.bf16.mxu1 %v1029_v4  ;;  %v1031_v6 = vld [vmem:[%s1406_s10 + $0x80] sm:$0xff]   ;;  %v1034_v9 = vld [vmem:[%s1406_s10 + $0x58] sm:$0xff]   ;;  %v1035_v10 = vld [vmem:[%s1406_s10 + $0x88] sm:$0xff]   ;;  %s723_s13 = sshll.u32 %s290_s8, 4  ;;  %s1457_s9 = scalar_lea.hbm %s1512_s4, %s896_s12  ;;  %s1459_s13 = int_to_ptr.vmem [resolvable:$true] %s723_s13 }
  0x5f   : > { %922 = vmatpush3.bf16.msra.mxu1 %v1031_v6  ;;  %v1036_v11 = vld [vmem:[%s1406_s10 + $0x18] sm:$0xff]   ;;  %v1037_v12 = vld [vmem:[%s1406_s10 + $0xd0] sm:$0xff]   ;;  %v1038_v13 = vld [vmem:[%s1406_s10 + $0x60] sm:$0xff]   ;;  %s296_s5 = scalar_lea.vmem %s1510_s2, %s295_s23  ;;  %s299_s30 = scalar_lea.vmem %s1511_s3, %s295_s23 }
  0x60   : > { %923 = vmatprep.subr.bf16.mxu1 %v1033_v8  ;;  %v1039_v14 = vld [vmem:[%s1406_s10 + $0x90] sm:$0xff]   ;;  %v1040_v15 = vld [vmem:[%s1406_s10 + $0x20] sm:$0xff]   ;;  %v1041_v16 = vld [vmem:[%s1406_s10 + $0xd8] sm:$0xff]   ;;  %s708_s18 = scalar_lea.sflag [#allocation4], %s1402_s11  ;;  %p1531_p13 = scmp.ne.s32.totalorder %s1522_s26, 0 }
  0x61   : > { %902 = vmatpush3.bf16.msra.mxu0 %v1028_v3  ;;  %v1042_v17 = vld [vmem:[%s1406_s10 + $0x68] sm:$0xff]   ;;  %v1043_v18 = vld [vmem:[%s1406_s10 + $0x98] sm:$0xff]   ;;  %v1045_v20 = vld [vmem:[%s1406_s10 + $0xe0] sm:$0xff]   ;;  %s1216_s23 = smov [#allocation7]  }
  0x62   : > { %903 = vmatprep.subr.bf16.mxu0 %v1030_v5  ;;  %v1044_v19 = vld [vmem:[%s1406_s10 + $0x28] sm:$0xff]   ;;  %v1046_v21 = vld [vmem:[%s1406_s10 + $0x70] sm:$0xff]   ;;  %v1047_v22 = vld [vmem:[%s1406_s10 + $0xa0] sm:$0xff]   ;;  %s1125_s25 = sshll.u32 %s1216_s23, 4  ;;  %s1126_s25 = int_to_ptr.vmem [resolvable:$false] %s1125_s25 }
  0x63   : > { %924 = vmatpush3.bf16.msra.mxu1 %v1035_v10  ;;  %v1048_v23 = vld [vmem:[%s1406_s10 + $0x30] sm:$0xff]   ;;  %v1049_v24 = vld [vmem:[%s1406_s10 + $0xe8] sm:$0xff]   ;;  %v1050_v25 = vld [vmem:[%s1406_s10 + $0x78] sm:$0xff]   ;;  %s1127_s28 = scalar_lea.vmem %s1126_s25, 512  ;;  %p1128_p10 = scmp.lt.s32.totalorder %s1459_s13, %s1126_s25 }
  0x64   : > { %925 = vmatprep.subr.bf16.mxu1 %v1037_v12  ;;  %v1051_v26 = vld [vmem:[%s1406_s10 + $0xa8] sm:$0xff]   ;;  %v1052_v27 = vld [vmem:[%s1406_s10 + $0x38] sm:$0xff]   ;;  %v1053_v28 = vld [vmem:[#allocation2] ss:$16 sps:$4 sm:$0xff]  }
  0x65   : > { %904 = vmatpush3.bf16.msra.mxu0 %v1032_v7  ;;  %v1055_v29 = vld [vmem:[#allocation2 + $0x4] ss:$16 sps:$4 sm:$0xff]   ;;  %v1058_v32 = vld [vmem:[%s1406_s10 + $0xf8] sm:$0xff]   ;;  %v893_v46 = vld [vmem:[%s296_s5] ss:$0 sm:$0xff] }
  0x66   : > { %905 = vmatprep.subr.bf16.mxu0 %v1034_v9  ;;  %v1056_v30 = vld [vmem:[%s1406_s10 + $0xf0] sm:$0xff]   ;;  %482 = vmatprep.mubr.bf16.mxu0 %v1055_v29  ;;  %v1059_v33 = vld [vmem:[%s1406_s10 + $0xb8] sm:$0xff]   ;;  %v894_v50 = vld [vmem:[%s299_s30] ss:$0 sm:$0xff] }
  0x67   : > { %926 = vmatpush3.bf16.msra.mxu1 %v1039_v14  ;;  %v1057_v31 = vld [vmem:[%s1406_s10 + $0xb0] sm:$0xff]   ;;  %v1062_v34 = vld [vmem:[#allocation2 + $0xc] ss:$16 sps:$4 sm:$0xff]   ;;  %v1060_v35 = vld [vmem:[#allocation2 + $0x8] ss:$16 sps:$4 sm:$0xff]   ;;  %s1121_s10 = scalar_lea.vmem %s1459_s13, 256 }
  0x68   : > { %927 = vmatprep.subr.bf16.mxu1 %v1041_v16  ;;  %669 = vmatprep.mubr.bf16.mxu1 %v1062_v34  ;;  %p1122_p11 = scmp.ne.s32.totalorder %s1459_s13, %s1121_s10  ;;  %p1129_p3 = scmp.lt.s32.totalorder %s1127_s28, %s1121_s10 }
  0x69   : > { %906 = vmatpush3.bf16.msra.mxu0 %v1036_v11 }
  0x6a   : > { %907 = vmatprep.subr.bf16.mxu0 %v1038_v13  ;;  %p1123_p4 = pnand %p1122_p11, %p1531_p13  ;;  %p1130_p6 = por %p1129_p3, %p1128_p10 }
  0x6b   : > { %928 = vmatpush3.bf16.msra.mxu1 %v1043_v18 }
  0x6c   : > { %929 = vmatprep.subr.bf16.mxu1 %v1045_v20  ;;  %p1124_p1 = pneg %p1123_p4 }
  0x6d   : > { %908 = vmatpush3.bf16.msra.mxu0 %v1040_v15 }
  0x6e   : > { %909 = vmatprep.subr.bf16.mxu0 %v1042_v17  ;;  %p1131_p0 = pnand %p1130_p6, %p1124_p1 }
  0x6f   : > { %930 = vmatpush3.bf16.msra.mxu1 %v1047_v22 }
  0x70   : > { %931 = vmatprep.subr.bf16.mxu1 %v1049_v24 }
  0x71   : > { %910 = vmatpush3.bf16.msra.mxu0 %v1044_v19 }
  0x72   : > { %911 = vmatprep.subr.bf16.mxu0 %v1046_v21 }
  0x73   : > { %932 = vmatpush3.bf16.msra.mxu1 %v1051_v26 }
  0x74   : > { %933 = vmatprep.subr.bf16.mxu1 %v1056_v30 }
  0x75   : > { %912 = vmatpush3.bf16.msra.mxu0 %v1048_v23 }
  0x76   : > { %913 = vmatprep.subr.bf16.mxu0 %v1050_v25 }
  0x77   : > { %934 = vmatpush3.bf16.msra.mxu1 %v1057_v31 }
  0x78   : > { %935 = vmatprep.subr.bf16.mxu1 %v1058_v32 }
  0x79   : > { %914 = vmatpush3.bf16.msra.mxu0 %v1052_v27 }
  0x7b   : > { %936 = vmatpush3.bf16.msra.mxu1 %v1059_v33 }
  0x7c   : > { %483 = vmatmul.mubr.bf16.vlgmr.msra.gmra.mrb[0].mxu0 %v1053_v28 }
  0x7e   : > { %670 = vmatmul.mubr.bf16.vlgmr.msra.gmra.mrb[0].mxu1 %v1060_v35 }
 0x14f   : > { %v915_v36 = vpop.f32.mrb[0].mxu0 }
 0x150   : > { %v916_v37 = vpop.f32.mrb[1].mxu0 }
 0x151   : > { %v917_v38 = vadd.f32 %v916_v37, %v915_v36  ;;  %v918_v39 = vpop.f32.mrb[2].mxu0  ;;  %v937_v42 = vpop.f32.mrb[0].mxu1 }
 0x152   : > { %v919_v40 = vpop.f32.mrb[3].mxu0  ;;  %v938_v43 = vpop.f32.mrb[1].mxu1 }
 0x153   : > { %v920_v41 = vadd.f32 %v919_v40, %v918_v39  ;;  %v939_v44 = vadd.f32 %v938_v43, %v937_v42  ;;  %v940_v45 = vpop.f32.mrb[2].mxu1 }
 0x154   : > { %v941_v47 = vpop.f32.mrb[3].mxu1 }
 0x155   : > { %v678_v48 = vadd.f32 %v939_v44, %v917_v38  ;;  %v942_v49 = vadd.f32 %v941_v47, %v940_v45 }
 0x157   : > { %v694_v51 = vmul.f32 %v893_v46, %v678_v48  ;;  %v679_v52 = vadd.f32 %v942_v49, %v920_v41 }
 0x159   : > { %v703_v53 = vadd.f32 %v894_v50, %v694_v51  ;;  %v695_v54 = vmul.f32 %v893_v46, %v679_v52 }
 0x15b   : > { %705 = vst [vmem:[%s290_s8] sm:$0xff] %v703_v53  ;;  %v704_v55 = vadd.f32 %v894_v50, %v695_v54 }
 0x15d   : > { %706 = vst [vmem:[%s290_s8 + $0x8] sm:$0xff] %v704_v55 }
 0x15e   : > { %1134 = shalt.err (!%p1131_p0)
}
 0x15f   : > { %s1135_s6 = scalar_lea.hbm %s1457_s9, 256  ;;  %s1139_s29 = scalar_lea.hbm %s1512_s4, 512 }
 0x160   : > { %p1136_p2 = scmp.ne.s32.totalorder %s1457_s9, %s1135_s6  ;;  %p1140_p5 = scmp.lt.u32.totalorder %s1457_s9, %s1512_s4 }
 0x161   : > { %p1141_p8 = scmp.lt.u32.totalorder %s1139_s29, %s1135_s6  ;;  %p1143_p11 = scmp.lt.u32.totalorder %s1135_s6, %s1457_s9 }
 0x162   : > { %p1137_p7 = pnand %p1136_p2, %p1531_p13 }
 0x163   : > { %p1142_p9 = por %p1141_p8, %p1140_p5 }
 0x164   : > { %p1138_p12 = pneg %p1137_p7 }
 0x165   : > { %p1144_p4 = por %p1143_p11, %p1142_p9 }
 0x167   : > { %p1145_p1 = pnand %p1144_p4, %p1138_p12 }
 0x169   : > { %1148 = shalt.err (!%p1145_p1)
}
 0x16a   : > { %s1217_s8 = smov 128   ;;  %s1218_s14 = smov 256  }
 0x16b   : > { %s1219_s21 = smov 8  }
 0x16c   : > { %949 = dma.vmem_to_hbm [thread:$0]  (%p1531_p13), %s1459_s13, 256, %s1457_s9, %s708_s18, %s1217_s8, %s1218_s14, %s1219_s21  }
 0x16d PF: > { %s738_s10 = sand.u32 1, %s1187_s15   ;;  %p1532_p10 = scmp.ne.s32.totalorder %s1523_s27, 0 }
 0x16e   : > { %p1533_p3 = scmp.ge.s32.totalorder %s1207_s20, 2  ;;  %s739_s23 = scalar_lea.sflag [#allocation4], %s738_s10 }
 0x170   : > { %p960_p6 = pnand %p1533_p3, %p1532_p10 }
 0x172   : > { %1182 = dma.done.wait (!%p960_p6), %s739_s23, 256  }
 0x173   : > { %1184 = vsyncadd (!%p960_p6), %s739_s23, 4294967040  ;;  %s21_s20 = sadd.s32 1, %s1207_s20   ;;  %s1534_s15 = smov %s1191_s16 }
 0x174   : > { %p18_p0 = scmp.ge.s32.totalorder %s21_s20, 4   ;;  %s1535_s16 = smov %s1195_s17 }
 0x175   : > { %s1536_s17 = smov %s1363_s24  ;;  %s1537_s18 = smov %s1203_s19 }
 0x176   : > { %s1538_s19 = smov %s1540_s7  ;;  %20 = sbr.rel (!%p18_p0) target bundleno = 7 (0x7), region = 101 }
 0x17d   :  { %744 = vsyncpa [#allocation3], 1 }
 0x17e   :  { %746 = vsyncpa [#allocation3 + $0x1], 1 }
 0x17f   :  { %747 = vsyncpa [#allocation6], 1 }
 0x180   :  { %749 = vsyncpa [#allocation6 + $0x1], 1 }
 0x181   :  { %750 = vsyncpa [#allocation4], 1 }
 0x182   :  { %752 = vsyncpa [#allocation4 + $0x1], 1 }

</bundles_post_ra>
